<compile_context>
chip_gen: v6e
topology: v6e:2x2x1
jax: 0.10.0
libtpu: 0.0.40
codegen_flags: <defaults>
</compile_context>

<pallas_src>
import functools
import math

import jax
import jax.numpy as jnp
from jax.experimental import pallas as pl
from jax.experimental.pallas import tpu as pltpu

_LANE = 128
_SUBLANE = 8
_TILE_BYTES = 4 << 20          # per-buffer VMEM target (double-buffered in+out in flight)
_MIN_PARALLEL_STEPS = 4        # >= 2 grid steps per TensorCore on v7x megacore


def _round_up(x, m):
    return ((x + m - 1) // m) * m


def _sublane_pad(dtype):
    # second-to-last dim padding: 8 for f32, 16 for bf16, 32 for int8/fp8
    return max(1, 32 // jnp.dtype(dtype).itemsize)


@functools.lru_cache(maxsize=None)
def _vmem_limit_cap():
    """Generation-aware ceiling for vmem_limit_bytes (physical VMEM - headroom)."""
    cap_physical = 64 << 20                       # conservative fallback (v7x-sized)
    try:
        info = pltpu.get_tpu_info()
        cap_physical = int(getattr(info, "vmem_capacity_bytes", cap_physical))
    except Exception:
        pass
    # leave 16 MiB headroom for compiler-internal scratch / double-buffer slack
    return max(32 << 20, cap_physical - (16 << 20))


def _vmem_limit(tile_io_bytes, tile_f32_bytes):
    # double-buffered in + out tiles (input dtype) + f32 compute scratch + headroom
    need = 4 * int(tile_io_bytes) + 4 * int(tile_f32_bytes) + (4 << 20)
    return int(min(_vmem_limit_cap(), max(32 << 20, need)))


def _pick_row_tile(n_rows, padded_row_bytes):
    """Largest sublane-multiple row tile fitting the budget, keeping the grid at
    >= _MIN_PARALLEL_STEPS steps (>= 2 per core on v7x) when the array allows."""
    tm = max(_SUBLANE, _TILE_BYTES // max(1, padded_row_bytes))
    tm = (tm // _SUBLANE) * _SUBLANE
    if tm * _MIN_PARALLEL_STEPS > n_rows:
        tm = _round_up(pl.cdiv(n_rows, _MIN_PARALLEL_STEPS), _SUBLANE)
    if tm >= n_rows:
        return n_rows                              # one full block (== full dim, legal)
    return tm


def _pick_lane_tile(n_batch, length, padded_col_bytes):
    """Largest lane tile (multiple of 128, or == length) fitting the budget, keeping
    n_batch * n_lane_steps >= _MIN_PARALLEL_STEPS when the spatial extent allows."""
    tl = max(_LANE, _TILE_BYTES // max(1, padded_col_bytes))
    tl = (tl // _LANE) * _LANE
    splits = pl.cdiv(_MIN_PARALLEL_STEPS, n_batch)
    if splits > 1 and tl * splits > length:
        tl = max(_LANE, _round_up(pl.cdiv(length, splits), _LANE))
    if tl >= length:
        return length
    return tl


# --------------------------------------------------------------------------
# Kernels
# --------------------------------------------------------------------------
def _ln_rows_kernel(x_ref, w_ref, b_ref, o_ref, *, eps):
    # x_ref: (tm, C)  w_ref/b_ref: (1, C)  o_ref: (tm, C);  normalize each row.
    x = x_ref[...].astype(jnp.float32)
    mean = jnp.mean(x, axis=-1, keepdims=True)
    xc = x - mean
    var = jnp.mean(xc * xc, axis=-1, keepdims=True)
    inv = jax.lax.rsqrt(var + eps)
    y = xc * inv * w_ref[...].astype(jnp.float32) + b_ref[...].astype(jnp.float32)
    o_ref[...] = y.astype(o_ref.dtype)


def _ln_packed_kernel(x_ref, w_ref, b_ref, o_ref, *, group_c, eps):
    # x_ref: (tm, GC) -- each row holds G independent C-length groups laid out
    # contiguously along the lane axis.  The segmented group-sum is a matmul
    # with a block-diagonal 0/1 matrix generated in-kernel (no HBM operand).
    # x is split 3-way into bf16 terms so three DEFAULT bf16 MXU passes per
    # reduce reproduce the f32 result (error ~2^-24), vs 6 passes for HIGHEST.
    gc = x_ref.shape[-1]
    inv_c = 1.0 / group_c
    r = jax.lax.broadcasted_iota(jnp.int32, (gc, gc), 0) // group_c
    c = jax.lax.broadcasted_iota(jnp.int32, (gc, gc), 1) // group_c
    a = jnp.where(r == c, 1.0, 0.0).astype(jnp.bfloat16)   # exact 0/1 in bf16

    def group_sum(v):                                       # v: f32
        v1 = v.astype(jnp.bfloat16)
        r1 = v - v1.astype(jnp.float32)
        v2 = r1.astype(jnp.bfloat16)
        v3 = (r1 - v2.astype(jnp.float32)).astype(jnp.bfloat16)
        out = jnp.dot(v1, a, preferred_element_type=jnp.float32)
        out = out + jnp.dot(v2, a, preferred_element_type=jnp.float32)
        out = out + jnp.dot(v3, a, preferred_element_type=jnp.float32)
        return out

    x = x_ref[...].astype(jnp.float32)
    mean = group_sum(x) * inv_c
    xc = x - mean
    var = group_sum(xc * xc) * inv_c
    inv = jax.lax.rsqrt(var + eps)
    y = xc * inv * w_ref[...].astype(jnp.float32) + b_ref[...].astype(jnp.float32)
    o_ref[...] = y.astype(o_ref.dtype)


def _ln_cfirst_kernel(x_ref, w_ref, b_ref, o_ref, *, eps):
    # x_ref: (1, C, TL) -- C on sublanes, spatial tile on lanes.  Normalize over C.
    x = x_ref[...].astype(jnp.float32)
    mean = jnp.mean(x, axis=1, keepdims=True)          # sublane reduction
    xc = x - mean
    var = jnp.mean(xc * xc, axis=1, keepdims=True)
    inv = jax.lax.rsqrt(var + eps)
    w = w_ref[...].astype(jnp.float32)[None]           # (1, C, 1)
    b = b_ref[...].astype(jnp.float32)[None]
    o_ref[...] = (xc * inv * w + b).astype(o_ref.dtype)


# --------------------------------------------------------------------------
# pallas_call wrappers
# --------------------------------------------------------------------------
def _layernorm_rows(x2d, weight, bias, eps):
    """Row-wise layer norm over the last axis of a (M, C) array (C on lanes)."""
    M, C = x2d.shape
    it = x2d.dtype.itemsize
    padded_row_bytes = _round_up(C, _LANE) * it
    tm = _pick_row_tile(M, padded_row_bytes)
    grid = (pl.cdiv(M, tm),)                       # ragged last block handled by Pallas
    w2d = weight.reshape(1, C)
    b2d = bias.reshape(1, C)
    tile_elems = _round_up(tm, _sublane_pad(x2d.dtype)) * _round_up(C, _LANE)
    nbytes = x2d.size * it
    return pl.pallas_call(
        functools.partial(_ln_rows_kernel, eps=eps),
        out_shape=jax.ShapeDtypeStruct((M, C), x2d.dtype),
        grid_spec=pltpu.PrefetchScalarGridSpec(
            num_scalar_prefetch=0,
            grid=grid,
            in_specs=[
                pl.BlockSpec((tm, C), lambda i: (i, 0)),
                pl.BlockSpec((1, C), lambda i: (0, 0)),
                pl.BlockSpec((1, C), lambda i: (0, 0)),
            ],
            out_specs=pl.BlockSpec((tm, C), lambda i: (i, 0)),
        ),
        compiler_params=pltpu.CompilerParams(
            dimension_semantics=("parallel",),
            vmem_limit_bytes=_vmem_limit(tile_elems * it, tile_elems * 4),
        ),
        cost_estimate=pl.CostEstimate(
            flops=int(10 * M * C), transcendentals=int(M),
            bytes_accessed=int(2 * nbytes)),
    )(x2d, w2d, b2d)


def _layernorm_packed(x2d, weight, bias, eps, group):
    """Layer norm where each (M//G, G*C) row holds G independent C-groups."""
    Mg, GC = x2d.shape
    C = GC // group
    it = x2d.dtype.itemsize
    tm = _pick_row_tile(Mg, GC * it)
    grid = (pl.cdiv(Mg, tm),)
    w2d = jnp.tile(weight, group).reshape(1, GC)
    b2d = jnp.tile(bias, group).reshape(1, GC)
    tile_elems = _round_up(tm, _sublane_pad(x2d.dtype)) * GC
    nbytes = x2d.size * it
    return pl.pallas_call(
        functools.partial(_ln_packed_kernel, group_c=C, eps=eps),
        out_shape=jax.ShapeDtypeStruct((Mg, GC), x2d.dtype),
        grid_spec=pltpu.PrefetchScalarGridSpec(
            num_scalar_prefetch=0,
            grid=grid,
            in_specs=[
                pl.BlockSpec((tm, GC), lambda i: (i, 0)),
                pl.BlockSpec((1, GC), lambda i: (0, 0)),
                pl.BlockSpec((1, GC), lambda i: (0, 0)),
            ],
            out_specs=pl.BlockSpec((tm, GC), lambda i: (i, 0)),
        ),
        compiler_params=pltpu.CompilerParams(
            dimension_semantics=("parallel",),
            vmem_limit_bytes=_vmem_limit(
                tile_elems * it, tile_elems * 4 + 2 * GC * GC * 4),
        ),
        cost_estimate=pl.CostEstimate(
            flops=int(2 * 2 * 3 * Mg * GC * GC + 10 * Mg * GC),
            transcendentals=int(Mg * group),
            bytes_accessed=int(2 * nbytes)),
    )(x2d, w2d, b2d)


def _layernorm_channels_first(x3d, weight, bias, eps):
    """(N, C, L) layer norm over C with the spatial axis lane-dense (no transposes)."""
    N, C, L = x3d.shape
    it = x3d.dtype.itemsize
    padded_c = _round_up(C, _sublane_pad(x3d.dtype))
    tl = _pick_lane_tile(N, L, padded_c * it)
    grid = (N, pl.cdiv(L, tl))
    wc = weight.reshape(C, 1)
    bc = bias.reshape(C, 1)
    tile_elems = padded_c * _round_up(tl, _LANE)
    nbytes = x3d.size * it
    return pl.pallas_call(
        functools.partial(_ln_cfirst_kernel, eps=eps),
        out_shape=jax.ShapeDtypeStruct((N, C, L), x3d.dtype),
        grid_spec=pltpu.PrefetchScalarGridSpec(
            num_scalar_prefetch=0,
            grid=grid,
            in_specs=[
                pl.BlockSpec((1, C, tl), lambda n, l: (n, 0, l)),
                pl.BlockSpec((C, 1), lambda n, l: (0, 0)),
                pl.BlockSpec((C, 1), lambda n, l: (0, 0)),
            ],
            out_specs=pl.BlockSpec((1, C, tl), lambda n, l: (n, 0, l)),
        ),
        compiler_params=pltpu.CompilerParams(
            dimension_semantics=("parallel", "parallel"),
            vmem_limit_bytes=_vmem_limit(tile_elems * it, tile_elems * 4),
        ),
        cost_estimate=pl.CostEstimate(
            flops=int(10 * N * C * L), transcendentals=int(N * L),
            bytes_accessed=int(2 * nbytes)),
    )(x3d, wc, bc)


# --------------------------------------------------------------------------
# Module
# --------------------------------------------------------------------------
class LayerNorm:
    """JAX/Pallas port of the PyTorch LayerNorm (channels_last / channels_first)."""

    def __init__(self, normalized_shape, eps=1e-06, data_format="channels_last"):
        if data_format not in ["channels_last", "channels_first"]:
            raise NotImplementedError
        # Deterministic init identical to the PyTorch module: ones / zeros.
        self.weight = jnp.ones((normalized_shape,), dtype=jnp.float32)
        self.bias = jnp.zeros((normalized_shape,), dtype=jnp.float32)
        self.eps = eps
        self.data_format = data_format
        self.normalized_shape = (normalized_shape,)

    def __call__(self, x):
        C = self.normalized_shape[0]
        if self.data_format == "channels_first":
            # x: (N, C, H, W) — normalize over C.  View as (N, C, H*W); no transpose.
            assert x.shape[1] == C
            N = x.shape[0]
            L = 1
            for s in x.shape[2:]:
                L *= s
            y = _layernorm_channels_first(
                x.reshape(N, C, L), self.weight, self.bias, self.eps)
            return y.reshape(x.shape)

        # channels_last: x (..., C) — normalize over the trailing axis.
        assert x.shape[-1] == C
        orig_shape = x.shape
        M = x.size // C
        x2d = x.reshape(M, C)
        if C < _LANE:
            # Pack G C-groups per kernel row so G*C = lcm(C, 128) (lane-dense I/O).
            g0 = _LANE // math.gcd(C, _LANE)
            if g0 > 1 and g0 * C <= 512:
                main = (M // g0) * g0
                parts = []
                if main > 0:
                    y_main = _layernorm_packed(
                        x2d[:main].reshape(main // g0, g0 * C),
                        self.weight, self.bias, self.eps, g0)
                    parts.append(y_main.reshape(main, C))
                if main < M:
                    # remainder (< g0 rows): tiny, handled by the plain row kernel
                    parts.append(_layernorm_rows(
                        x2d[main:], self.weight, self.bias, self.eps))
                y = parts[0] if len(parts) == 1 else jnp.concatenate(parts, axis=0)
                return y.reshape(orig_shape)
        # C >= 128 is lane-dense already when C % 128 == 0.
        # TODO(synk): 128 < C with C % 128 != 0 still stores a masked <128-lane tail per row.
        y = _layernorm_rows(x2d, self.weight, self.bias, self.eps)
        return y.reshape(orig_shape)


# --------------------------------------------------------------------------
# Pure-JAX references + tests
# --------------------------------------------------------------------------
def _reference_channels_first(x, w, b, eps):
    u = x.mean(axis=1, keepdims=True)
    s = ((x - u) ** 2).mean(axis=1, keepdims=True)
    xn = (x - u) / jnp.sqrt(s + eps)
    return w[None, :, None, None] * xn + b[None, :, None, None]


def _reference_channels_last(x, w, b, eps):
    u = x.mean(axis=-1, keepdims=True)
    s = ((x - u) ** 2).mean(axis=-1, keepdims=True)
    xn = (x - u) / jnp.sqrt(s + eps)
    return xn * w + b


if __name__ == "__main__":
    key = jax.random.PRNGKey(0)
    k1, k2, k3, k4, kw, kb = jax.random.split(key, 6)

    N, C, H, W = 2, 4, 16, 16

    # --- channels_first path (NCHW, normalize over C; fused, no transposes) ---
    x_cf = jax.random.normal(k1, (N, C, H, W), dtype=jnp.float32)
    ln_cf = LayerNorm(C, eps=1e-6, data_format="channels_first")
    ln_cf.weight = 1.0 + 0.1 * jax.random.normal(kw, (C,), dtype=jnp.float32)
    ln_cf.bias = 0.1 * jax.random.normal(kb, (C,), dtype=jnp.float32)
    y_cf = jax.block_until_ready(ln_cf(x_cf))
    ref_cf = _reference_channels_first(x_cf, ln_cf.weight, ln_cf.bias, 1e-6)
    assert jnp.allclose(y_cf, ref_cf, atol=1e-5, rtol=1e-5)

    # --- channels_last path, small C (packed lane-dense kernel) ---
    x_cl = jax.random.normal(k2, (N, H, W, C), dtype=jnp.float32)
    ln_cl = LayerNorm(C, eps=1e-6, data_format="channels_last")
    ln_cl.weight = 1.0 + 0.1 * jax.random.normal(kb, (C,), dtype=jnp.float32)
    ln_cl.bias = 0.1 * jax.random.normal(kw, (C,), dtype=jnp.float32)
    y_cl = jax.block_until_ready(ln_cl(x_cl))
    ref_cl = _reference_channels_last(x_cl, ln_cl.weight, ln_cl.bias, 1e-6)
    assert jnp.allclose(y_cl, ref_cl, atol=1e-5, rtol=1e-5)

    # --- channels_last path, M not divisible by the packing group (packed + tail) ---
    x_rg = jax.random.normal(k4, (1, 7, 5, C), dtype=jnp.float32)   # M = 35, g0 = 32
    y_rg = jax.block_until_ready(ln_cl(x_rg))
    ref_rg = _reference_channels_last(x_rg, ln_cl.weight, ln_cl.bias, 1e-6)
    assert jnp.allclose(y_rg, ref_rg, atol=1e-5, rtol=1e-5)

    # --- channels_last path, larger C (plain row kernel, ragged grid) ---
    C2 = 256
    x_big = jax.random.normal(k3, (3, 6, C2), dtype=jnp.float32)
    ln_big = LayerNorm(C2, eps=1e-6, data_format="channels_last")
    y_big = jax.block_until_ready(ln_big(x_big))
    ref_big = _reference_channels_last(x_big, ln_big.weight, ln_big.bias, 1e-6)
    assert jnp.allclose(y_big, ref_big, atol=1e-5, rtol=1e-5)

    print("KERNEL_OK")
</pallas_src>

<mosaic_0001>
module attributes {stable_mosaic.version = 11 : i64} {
  func.func @_ln_cfirst_kernel(%arg0: i32, %arg1: i32, %arg2: memref<1x4x128xf32, #tpu.memory_space<vmem>>, %arg3: memref<4x1xf32, #tpu.memory_space<vmem>>, %arg4: memref<4x1xf32, #tpu.memory_space<vmem>>, %arg5: memref<1x4x128xf32, #tpu.memory_space<vmem>>) attributes {dimension_semantics = [#tpu.dimension_semantics<parallel>, #tpu.dimension_semantics<parallel>], iteration_bounds = array<i64: 2, 2>, scalar_prefetch = 0 : i64, scratch_operands = 0 : i64, tpu.core_type = #tpu.core_type<tc>, window_params = [{transform_indices = @transform_0, window_bounds = array<i64: 1, 4, 128>}, {pipeline_mode = #tpu.pipeline_mode<synchronous>, transform_indices = @transform_1, window_bounds = array<i64: 4, 1>}, {pipeline_mode = #tpu.pipeline_mode<synchronous>, transform_indices = @transform_2, window_bounds = array<i64: 4, 1>}, {transform_indices = @transform_3, window_bounds = array<i64: 1, 4, 128>}]} {
    %c0 = arith.constant 0 : index
    %c0_0 = arith.constant 0 : index
    %c0_1 = arith.constant 0 : index
    %0 = vector.load %arg2[%c0, %c0_0, %c0_1] : memref<1x4x128xf32, #tpu.memory_space<vmem>>, vector<1x4x128xf32>
    %cst = arith.constant dense<0.000000e+00> : vector<1x128xf32>
    %1 = vector.multi_reduction <add>, %0, %cst [1] : vector<1x4x128xf32> to vector<1x128xf32>
    %2 = vector.shape_cast %1 : vector<1x128xf32> to vector<1x1x128xf32>
    %cst_2 = arith.constant 4.000000e+00 : f32
    %3 = vector.broadcast %cst_2 : f32 to vector<1x1x128xf32>
    %4 = arith.divf %2, %3 : vector<1x1x128xf32>
    %5 = vector.broadcast %4 : vector<1x1x128xf32> to vector<1x4x128xf32>
    %6 = arith.subf %0, %5 : vector<1x4x128xf32>
    %7 = arith.mulf %6, %6 : vector<1x4x128xf32>
    %cst_3 = arith.constant dense<0.000000e+00> : vector<1x128xf32>
    %8 = vector.multi_reduction <add>, %7, %cst_3 [1] : vector<1x4x128xf32> to vector<1x128xf32>
    %9 = vector.shape_cast %8 : vector<1x128xf32> to vector<1x1x128xf32>
    %cst_4 = arith.constant 4.000000e+00 : f32
    %10 = vector.broadcast %cst_4 : f32 to vector<1x1x128xf32>
    %11 = arith.divf %9, %10 : vector<1x1x128xf32>
    %cst_5 = arith.constant 9.99999997E-7 : f32
    %12 = vector.broadcast %cst_5 : f32 to vector<1x1x128xf32>
    %13 = arith.addf %11, %12 : vector<1x1x128xf32>
    %14 = math.rsqrt %13 : vector<1x1x128xf32>
    %c0_6 = arith.constant 0 : index
    %c0_7 = arith.constant 0 : index
    %15 = vector.load %arg3[%c0_6, %c0_7] : memref<4x1xf32, #tpu.memory_space<vmem>>, vector<4x1xf32>
    %16 = vector.shape_cast %15 : vector<4x1xf32> to vector<1x4x1xf32>
    %c0_8 = arith.constant 0 : index
    %c0_9 = arith.constant 0 : index
    %17 = vector.load %arg4[%c0_8, %c0_9] : memref<4x1xf32, #tpu.memory_space<vmem>>, vector<4x1xf32>
    %18 = vector.shape_cast %17 : vector<4x1xf32> to vector<1x4x1xf32>
    %19 = vector.broadcast %14 : vector<1x1x128xf32> to vector<1x4x128xf32>
    %20 = arith.mulf %6, %19 : vector<1x4x128xf32>
    %21 = vector.broadcast %16 : vector<1x4x1xf32> to vector<1x4x128xf32>
    %22 = arith.mulf %20, %21 : vector<1x4x128xf32>
    %23 = vector.broadcast %18 : vector<1x4x1xf32> to vector<1x4x128xf32>
    %24 = arith.addf %22, %23 : vector<1x4x128xf32>
    %c0_10 = arith.constant 0 : index
    %c0_11 = arith.constant 0 : index
    %c0_12 = arith.constant 0 : index
    %25 = vector.load %arg5[%c0_10, %c0_11, %c0_12] : memref<1x4x128xf32, #tpu.memory_space<vmem>>, vector<1x4x128xf32>
    tpu.vector_store %arg5[%c0_10, %c0_11, %c0_12], %24 {strides = array<i32>} : memref<1x4x128xf32, #tpu.memory_space<vmem>>, vector<1x4x128xf32>,
    return
  }
  func.func @transform_0(%arg0: i32, %arg1: i32) -> (i32, i32, i32) {
    %c0_i32 = arith.constant 0 : i32
    %c0_i32_0 = arith.constant 0 : i32
    return %arg0, %c0_i32, %arg1 : i32, i32, i32
  }
  func.func @transform_1(%arg0: i32, %arg1: i32) -> (i32, i32) {
    %c0_i32 = arith.constant 0 : i32
    %c0_i32_0 = arith.constant 0 : i32
    %c0_i32_1 = arith.constant 0 : i32
    return %c0_i32, %c0_i32_0 : i32, i32
  }
  func.func @transform_2(%arg0: i32, %arg1: i32) -> (i32, i32) {
    %c0_i32 = arith.constant 0 : i32
    %c0_i32_0 = arith.constant 0 : i32
    %c0_i32_1 = arith.constant 0 : i32
    return %c0_i32, %c0_i32_0 : i32, i32
  }
  func.func @transform_3(%arg0: i32, %arg1: i32) -> (i32, i32, i32) {
    %c0_i32 = arith.constant 0 : i32
    %c0_i32_0 = arith.constant 0 : i32
    return %arg0, %c0_i32, %arg1 : i32, i32, i32
  }
}

</mosaic_0001>

<bundles_post_ra>
// kernel: tpu_custom_call.1
= control target key start
LH: loop header
LB: loop body
LE: loop exit
PB: predicated region body
PF: predicated region fallthrough
CT: control target
= control target key end

     0   :  { %8 = vsyncpa [#allocation3], 0  ;;  %s756_s0 = inlined_call_operand.hbm [shape: f32[2,4,256], index: 0, kind: input, shape index: {}]   ;;  %s757_s1 = inlined_call_operand.vmem [shape: f32[4,1], index: 1, kind: input, shape index: {}]   ;;  %s758_s2 = inlined_call_operand.vmem [shape: f32[4,1], index: 2, kind: input, shape index: {}]   ;;  %s759_s3 = inlined_call_operand.hbm [shape: f32[2,4,256], index: 3, kind: output, shape index: {}]  }
   0x1   :  { %10 = vsyncpa [#allocation3 + $0x1], 0 }
   0x2   :  { %11 = vsyncpa [#allocation4], 0 }
   0x3   :  { %13 = vsyncpa [#allocation4 + $0x1], 0  ;;  %s590_s12 = smov 0   ;;  %s592_s13 = smov 0  }
   0x4   :  { %s594_s14 = smov 0   ;;  %s596_s15 = smov 0  }
   0x5   :  { %s598_s16 = smov 0   ;;  %s600_s17 = smov 0  }
   0x6   :  { %s602_s18 = smov 0   ;;  %s604_s19 = smov 0  }
   0x7 LB: > { %s344_s20 = sadd.s32 4294967295, %s565_s19   ;;  %s345_s21 = sadd.s32 4294967294, %s565_s19   ;;  %s565_s19 = sphi %s604_s19, %s19_s19   ;;  %s561_s18 = sphi %s602_s18, %s775_s18   ;;  %s557_s17 = sphi %s600_s17, %s774_s17   ;;  %s553_s16 = sphi %s598_s16, %s773_s16   ;;  %s549_s15 = sphi %s596_s15, %s772_s15   ;;  %s545_s14 = sphi %s594_s14, %s771_s14   ;;  %s541_s13 = sphi %s592_s13, %s770_s13   ;;  %s537_s12 = sphi %s590_s12, %s769_s12  }
   0x8   : > { %s28_s22 = sadd.s32 1, %s557_s17  ;;  %s31_s23 = sadd.s32 1, %s561_s18 }
   0x9   : > { %p29_p0 = scmp.ge.s32.totalorder %s28_s22, 2  ;;  %s40_s24 = sadd.s32 1, %s545_s14 }
   0xa   : > { %p47_p1 = scmp.ne.s32.totalorder %s545_s14, %s541_s13  ;;  %p48_p2 = scmp.eq.s32.totalorder %s565_s19, 0 }
   0xb   : > { %s777_s22 = smov (%p29_p0, %s28_s22), 0  ;;  %s779_s23 = smov (!%p29_p0, %s31_s23), %s561_s18 }
   0xc   : > { %s36_s25 = ssub.s32 %s557_s17, %s777_s22  ;;  %p643_p3 = por %p48_p2, %p47_p1 }
   0xd   : > { %p33_p4 = scmp.ge.s32.totalorder %s779_s23, 2  ;;  %p53_p5 = scmp.ne.s32.totalorder %s541_s13, %s537_s12 }
   0xe   : > { %p54_p6 = scmp.eq.s32.totalorder %s344_s20, 0  ;;  %p121_p7 = scmp.eq.s32.totalorder %s344_s20, 3 }
   0xf   : > { %s781_s23 = smov (%p33_p4, %s779_s23), 0  ;;  %p127_p10 = scmp.eq.s32.totalorder %s345_s21, 3 }
  0x10   : > { %762 = sst [smem:[#allocation8_spill]] %s781_s23  ;;  %p651_p8 = por %p54_p6, %p53_p5 }
  0x11   : > { %p655_p9 = por %p121_p7, %p47_p1  ;;  %s35_s29 = ssub.s32 %s561_s18, %s781_s23 }
  0x12   : > { %s37_s30 = sor.u32 %s36_s25, %s35_s29  ;;  %p661_p12 = por %p127_p10, %p53_p5 }
  0x13   : > { %p38_p11 = scmp.eq.s32.totalorder %s37_s30, 0  ;;  %p371_p13 = scmp.lt.s32.totalorder %s565_s19, 4 }
  0x14   : > { %s765_s4 = scalar_select %p661_p12, 1, 0 }
  0x15   : > { %s153_s5 = sand.u32 1, %s545_s14   ;;  %s349_s8 = sshll.u32 %s561_s18, 1 }
  0x16   : > { %s668_s6 = scalar_select %p38_p11, %s545_s14, %s40_s24  }
  0x17   : > { %s348_s7 = sshll.u32 %s153_s5, 2  ;;  %s162_s9 = sadd.s32 %s557_s17, %s349_s8 }
  0x18   : > { %s157_s10 = scalar_lea.vmem [#allocation2], %s348_s7  ;;  %s350_s20 = sshll.u32 %s162_s9, 6 }
  0x19   : > { %s166_s11 = sshll.u32 %s157_s10, 4  ;;  %s164_s25 = scalar_lea.hbm %s756_s0, %s350_s20  ;;  %s167_s11 = int_to_ptr.vmem [resolvable:$true] %s166_s11 }
  0x1a   : > { %p677_p0 = pnand %p371_p13, %p643_p3  ;;  %p351_p1 = scmp.ge.s32.totalorder %s565_s19, 1 }
  0x1b   : > { %p171_p2 = scmp.lt.s32.totalorder %s565_s19, 5  ;;  %s154_s24 = scalar_lea.sflag [#allocation3], %s153_s5 }
  0x1c   : > { %p443_p4 = pneg %p677_p0  ;;  %s454_s30 = scalar_lea.vmem %s167_s11, 64 }
  0x1d   : > { %p455_p5 = scmp.ne.s32.totalorder %s167_s11, %s454_s30  ;;  %s567_s7 = smov [#allocation2]  }
  0x1e   : > { %s459_s8 = sshll.u32 %s567_s7, 4  ;;  %s460_s8 = int_to_ptr.vmem [resolvable:$false] %s459_s8 }
  0x1f   : > { %p457_p6 = pnand %p455_p5, %p443_p4  ;;  %s461_s23 = scalar_lea.vmem %s460_s8, 128 }
  0x20   : > { %p462_p10 = scmp.lt.s32.totalorder %s167_s11, %s460_s8  ;;  %p463_p11 = scmp.lt.s32.totalorder %s461_s23, %s454_s30 }
  0x21   : > { %p458_p7 = pneg %p457_p6 }
  0x22   : > { %p464_p3 = por %p463_p11, %p462_p10 }
  0x24   : > { %p465_p13 = pnand %p464_p3, %p458_p7 }
  0x26   : > { %468 = shalt.err (!%p465_p13)
}
  0x27   : > { %366 = dma.hbm_to_vmem [thread:$0]  (!%p677_p0), %s164_s25, 64, %s167_s11, %s154_s24  }
  0x28   : > { %p172_p12 = pnand %p351_p1, %p171_p2 }
  0x29   : > { %s692_s26 = sand.u32 (!%p172_p12), 1, %s541_s13  }
  0x2a   : > { %175 = sbr.rel (%p172_p12) target bundleno = 193 (0xc1), region = 32  ;;  %s352_s5 = sshll.u32 (!%p172_p12), %s692_s26, 2 }
  0x2b   : > { %s178_s9 = scalar_lea.sflag (!%p172_p12), [#allocation3], %s692_s26  ;;  %s181_s10 = scalar_lea.vmem (!%p172_p12), [#allocation2], %s352_s5 }
  0x2f   : > { %528 = dma.done.wait (%p651_p8), %s178_s9, 64  }
  0x30   : > { %530 = vsyncadd (%p651_p8), %s178_s9, 4294967232  ;;  %v568_v0 = vmov 0   ;;  %v227_v1 = vld [vmem:[%s757_s1] sm:$0xf]  ;;  %vm205_vm0 = vcmask 1043456   ;;  %s355_s27 = sshll.u32 %s553_s16, 1 }
  0x31   : > { %438 = vset.pattern.permute.xlu0 %v568_v0  ;;  %v228_v2 = vld [vmem:[%s758_s2] sm:$0xf]  ;;  %s255_s29 = sadd.s32 %s549_s15, %s355_s27  ;;  %s203_s30 = scalar_lea.vmem [#allocation5], %s352_s5 }
  0x32   : > { %232 = vperm.xlu0 %438, %v227_v1   ;;  %v204_v3 = vld [vmem:[%s181_s10] sm:$0xf]  ;;  %s356_s24 = sshll.u32 %s255_s29, 6  ;;  %s259_s7 = sshll.u32 %s203_s30, 4  ;;  %s260_s7 = int_to_ptr.vmem [resolvable:$true] %s259_s7 }
  0x33   : > { %v206_v4 = vsel %vm205_vm0, %v204_v3, 0.0  ;;  %s257_s9 = scalar_lea.hbm %s759_s3, %s356_s24  ;;  %s244_s10 = scalar_lea.sflag [#allocation4], %s692_s26 }
  0x34   : > { %v207_v5 = vrot.slane %v206_v4, 4  ;;  %s469_s11 = scalar_lea.vmem %s260_s7, 64  ;;  %s569_s15 = smov [#allocation5]  }
  0x35   : > { %p470_p8 = scmp.ne.s32.totalorder %s260_s7, %s469_s11  ;;  %s473_s16 = sshll.u32 %s569_s15, 4  ;;  %s474_s16 = int_to_ptr.vmem [resolvable:$false] %s473_s16 }
  0x36   : > { %238 = vperm.xlu0 %438, %v228_v2   ;;  %v208_v6 = vadd.f32 %v207_v5, %v206_v4  ;;  %s475_s5 = scalar_lea.vmem %s474_s16, 128  ;;  %p476_p1 = scmp.lt.s32.totalorder %s260_s7, %s474_s16 }
  0x37   : > { %p471_p12 = pnand %p470_p8, %p655_p9  ;;  %p477_p2 = scmp.lt.s32.totalorder %s475_s5, %s469_s11 }
  0x38   : > { %v209_v7 = vrot.slane %v208_v6, 2 }
  0x39   : > { %p472_p0 = pneg %p471_p12  ;;  %p478_p4 = por %p477_p2, %p476_p1 }
  0x3a   : > { %v210_v8 = vadd.f32 %v209_v7, %v208_v6 }
  0x3b   : > { %p479_p5 = pnand %p478_p4, %p472_p0 }
  0x3c   : > { %v211_v9 = vrot.slane %v210_v8, 1 }
  0x3e   : > { %v212_v10 = vadd.f32 %v211_v9, %v210_v8 }
  0x40   : > { %v214_v11 = vmul.f32 0.25, %v212_v10 }
  0x42   : > { %v215_v12 = vsub.f32 %v204_v3, %v214_v11 }
  0x44   : > { %v216_v13 = vmul.f32 %v215_v12, %v215_v12 }
  0x46   : > { %v217_v14 = vsel %vm205_vm0, %v216_v13, 0.0 }
  0x47   : > { %v218_v15 = vrot.slane %v217_v14, 4 }
  0x49   : > { %v219_v16 = vadd.f32 %v218_v15, %v217_v14 }
  0x4b   : > { %v220_v17 = vrot.slane %v219_v16, 2 }
  0x4d   : > { %v221_v18 = vadd.f32 %v220_v17, %v219_v16 }
  0x4f   : > { %v222_v19 = vrot.slane %v221_v18, 1 }
  0x51   : > { %v223_v20 = vadd.f32 %v222_v19, %v221_v18 }
  0x53   : > { %v224_v21 = vmul.f32 0.25, %v223_v20 }
  0x55   : > { %v225_v22 = vadd.f32 1e-06, %v224_v21 }
  0x57   : > { %439 = vrsqrt.f32 %v225_v22 }
  0x64   : > { %v440_v23 = vpop.eup %439 }
  0x65   : > { %v229_v24 = vmul.f32 %v440_v23, %v215_v12 }
  0xad   : > { %v233_v25 = vpop.permute.xlu0 %232 }
  0xae   : > { %v235_v26 = vmul.f32 %v233_v25, %v229_v24 }
  0xb1   : > { %v239_v27 = vpop.permute.xlu0 %238 }
  0xb2   : > { %v241_v28 = vadd.f32 %v239_v27, %v235_v26 }
  0xb4   : > { %242 = vst [vmem:[%s203_s30] sm:$0xf] %v241_v28 }
  0xb5   : > { %482 = shalt.err (!%p479_p5)
}
  0xb6   : > { %s483_s20 = scalar_lea.hbm %s257_s9, 64  ;;  %s487_s25 = scalar_lea.hbm %s759_s3, 256 }
  0xb7   : > { %p484_p6 = scmp.ne.s32.totalorder %s257_s9, %s483_s20  ;;  %p488_p11 = scmp.lt.s32.totalorder %s257_s9, %s759_s3 }
  0xb8   : > { %p489_p3 = scmp.lt.s32.totalorder %s487_s25, %s483_s20 }
  0xb9   : > { %p485_p7 = pnand %p484_p6, %p655_p9 }
  0xba   : > { %p490_p13 = por %p489_p3, %p488_p11 }
  0xbb   : > { %p486_p10 = pneg %p485_p7 }
  0xbd   : > { %p491_p8 = pnand %p490_p13, %p486_p10 }
  0xbf   : > { %494 = shalt.err (!%p491_p8)
}
  0xc0   : > { %361 = dma.vmem_to_hbm [thread:$0]  (%p655_p9), %s260_s7, 64, %s257_s9, %s244_s10  }
  0xc1 PF: > { %p372_p12 = scmp.ge.s32.totalorder %s565_s19, 2  ;;  %s271_s24 = sand.u32 1, %s537_s12  }
  0xc2   : > { %p767_p0 = scmp.ne.s32.totalorder %s765_s4, 0  ;;  %s272_s30 = scalar_lea.sflag [#allocation4], %s271_s24 }
  0xc4   : > { %p368_p1 = pnand %p372_p12, %p767_p0 }
  0xc6   : > { %p369_p2 = pneg %p368_p1 }
  0xc8   : > { %532 = dma.done.wait (%p369_p2), %s272_s30, 64  }
  0xc9   : > { %534 = vsyncadd (%p369_p2), %s272_s30, 4294967232  ;;  %s19_s19 = sadd.s32 1, %s565_s19   ;;  %s768_s28 = sld [smem:[#allocation8_spill]] }
  0xca   : > { %p16_p4 = scmp.ge.s32.totalorder %s19_s19, 6   ;;  %s769_s12 = smov %s541_s13 }
  0xcb   : > { %s770_s13 = smov %s545_s14  ;;  %s771_s14 = smov %s668_s6 }
  0xcc   : > { %s772_s15 = smov %s557_s17  ;;  %s773_s16 = smov %s561_s18 }
  0xcd   : > { %s774_s17 = smov %s777_s22  ;;  %18 = sbr.rel (!%p16_p4) target bundleno = 7 (0x7), region = 77 }
  0xcf   : > { %s775_s18 = smov %s768_s28 }
  0xd2   :  { %277 = vsyncpa [#allocation3], 1 }
  0xd3   :  { %279 = vsyncpa [#allocation3 + $0x1], 1 }
  0xd4   :  { %280 = vsyncpa [#allocation4], 1 }
  0xd5   :  { %282 = vsyncpa [#allocation4 + $0x1], 1 }

</bundles_post_ra>
